<compile_context>
chip_gen: v6e
topology: v6e:2x2x1
jax: 0.10.0
libtpu: 0.0.40
codegen_flags: <defaults>
</compile_context>

<pallas_src>
import jax
import jax.numpy as jnp
from jax.experimental import pallas as pl
from jax.experimental.pallas import tpu as pltpu


def _conv1x1_kernel(x_ref, w_ref, b_ref, o_ref):
    # x_ref: [M, C_in]      (rows = pixels, lanes = input channels)
    # w_ref: [C_in, C_out]  (pre-laid-out weight, lane-dense output channels)
    # b_ref: [1, C_out]
    # o_ref: [M, C_out]
    x = x_ref[...].astype(w_ref.dtype)          # no-op for the default f32 weight
    acc = jnp.dot(x, w_ref[...], preferred_element_type=jnp.float32)
    o_ref[...] = (acc + b_ref[...].astype(jnp.float32)).astype(o_ref.dtype)


def prepare_conv1x1_weight(weight_oihw, dtype=jnp.float32):
    """One-time (outside jit) re-layout of Conv2d weight [C_out, C_in, 1, 1] -> [C_in, C_out].

    Doing this once avoids a per-call transpose HLO that would materialize an extra
    HBM copy of the (dominant) weight tensor on every forward pass.  Pass
    dtype=jnp.bfloat16 to halve the dominant weight DMA if the accuracy budget allows
    (the kernel accumulates in f32 either way); default f32 preserves exact module
    semantics.
    """
    c_out, c_in = weight_oihw.shape[0], weight_oihw.shape[1]
    w = jnp.transpose(weight_oihw.reshape(c_out, c_in), (1, 0))
    return jnp.asarray(w, dtype=dtype)


@jax.jit
def conv2d_1x1(x_nchw, w_ic_oc, bias):
    """1x1 conv, stride 1, no padding.  Equivalent to nn.Conv2d(C_in, C_out, 1).

    x_nchw:  [N, C_in, H, W]  float32
    w_ic_oc: [C_in, C_out]    (from prepare_conv1x1_weight)
    bias:    [C_out]          float32
    returns: [N, C_out, H, W] float32
    """
    N, C_in, H, W = x_nchw.shape
    C_out = w_ic_oc.shape[1]
    M = N * H * W

    unit_spatial = (H == 1 and W == 1)
    if unit_spatial:
        # [N, C_in, 1, 1] -> [N, C_in]: pure reshape, no transpose / copy fusion.
        x_mat = x_nchw.reshape(M, C_in)
    else:
        # General path (not hit by this module): NCHW -> (N*H*W, C_in).
        x_mat = jnp.transpose(x_nchw, (0, 2, 3, 1)).reshape(M, C_in)

    b_mat = bias.reshape(1, C_out)

    w_bytes = w_ic_oc.dtype.itemsize
    flops = 2 * M * C_in * C_out + M * C_out
    bytes_accessed = (4 * M * C_in            # x
                      + w_bytes * C_in * C_out  # weight (dominant)
                      + 4 * C_out               # bias
                      + 4 * M * C_out)          # out

    out_mat = pl.pallas_call(
        _conv1x1_kernel,
        out_shape=jax.ShapeDtypeStruct((M, C_out), jnp.float32),
        in_specs=[
            pl.BlockSpec(memory_space=pltpu.MemorySpace.VMEM),  # x  [M, C_in]
            pl.BlockSpec(memory_space=pltpu.MemorySpace.VMEM),  # w  [C_in, C_out]
            pl.BlockSpec(memory_space=pltpu.MemorySpace.VMEM),  # b  [1, C_out]
        ],
        out_specs=pl.BlockSpec(memory_space=pltpu.MemorySpace.VMEM),
        cost_estimate=pl.CostEstimate(
            flops=flops, transcendentals=0, bytes_accessed=bytes_accessed),
    )(x_mat, w_ic_oc, b_mat)

    if unit_spatial:
        # [N, C_out] -> [N, C_out, 1, 1]: pure reshape, no transpose.
        return out_mat.reshape(N, C_out, 1, 1)
    out = out_mat.reshape(N, H, W, C_out)
    return jnp.transpose(out, (0, 3, 1, 2))


if __name__ == "__main__":
    C_IN, C_OUT = 68, 1632          # fixed by the module definition
    N, H, W = 1, 1, 1               # matches x437 = randn([1, 68, 1, 1])

    key = jax.random.PRNGKey(0)
    kx, kw, kb = jax.random.split(key, 3)

    x = jax.random.normal(kx, (N, C_IN, H, W), dtype=jnp.float32)
    # Deterministic synthetic parameters (shapes from Conv2d(68, 1632, 1)).
    weight = jax.random.normal(kw, (C_OUT, C_IN, 1, 1), dtype=jnp.float32) * 0.02
    bias = jax.random.normal(kb, (C_OUT,), dtype=jnp.float32) * 0.01

    # One-time weight layout outside jit (no per-call transpose/pad of the weight).
    w_ic_oc = jax.block_until_ready(prepare_conv1x1_weight(weight))

    out = conv2d_1x1(x, w_ic_oc, bias)
    out = jax.block_until_ready(out)
    assert out.shape == (N, C_OUT, H, W), out.shape

    # Cross-check against plain-JAX reference (same math as PyTorch conv2d 1x1).
    ref = (jnp.einsum("nchw,oc->nohw", x, weight.reshape(C_OUT, C_IN))
           + bias.reshape(1, C_OUT, 1, 1))
    assert jnp.allclose(out, ref, atol=1e-4, rtol=1e-4), float(jnp.max(jnp.abs(out - ref)))

    print("KERNEL_OK")
</pallas_src>

<mosaic_0001>
module attributes {stable_mosaic.version = 11 : i64} {
  func.func @_conv1x1_kernel(%arg0: memref<1x68xf32, #tpu.memory_space<vmem>>, %arg1: memref<68x1632xf32, #tpu.memory_space<vmem>>, %arg2: memref<1x1632xf32, #tpu.memory_space<vmem>>, %arg3: memref<1x1632xf32, #tpu.memory_space<vmem>>) attributes {dimension_semantics = [], scalar_prefetch = 0 : i64, scratch_operands = 0 : i64, tpu.core_type = #tpu.core_type<tc>} {
    %c0 = arith.constant 0 : index
    %c0_0 = arith.constant 0 : index
    %0 = vector.load %arg0[%c0, %c0_0] : memref<1x68xf32, #tpu.memory_space<vmem>>, vector<1x68xf32>
    %c0_1 = arith.constant 0 : index
    %c0_2 = arith.constant 0 : index
    %1 = vector.load %arg1[%c0_1, %c0_2] : memref<68x1632xf32, #tpu.memory_space<vmem>>, vector<68x1632xf32>
    %cst = arith.constant dense<0.000000e+00> : vector<1x1632xf32>
    %2 = tpu.matmul %0, %1, %cst {dimension_numbers = #tpu.dot_dimension_numbers<[1], [0], [0], [1], [0, 0, 1, 1], [], []>} : vector<1x68xf32>, vector<68x1632xf32>, vector<1x1632xf32> -> vector<1x1632xf32>
    %c0_3 = arith.constant 0 : index
    %c0_4 = arith.constant 0 : index
    %3 = vector.load %arg2[%c0_3, %c0_4] : memref<1x1632xf32, #tpu.memory_space<vmem>>, vector<1x1632xf32>
    %4 = arith.addf %2, %3 : vector<1x1632xf32>
    %c0_5 = arith.constant 0 : index
    %c0_6 = arith.constant 0 : index
    %5 = vector.load %arg3[%c0_5, %c0_6] : memref<1x1632xf32, #tpu.memory_space<vmem>>, vector<1x1632xf32>
    tpu.vector_store %arg3[%c0_5, %c0_6], %4 {strides = array<i32>} : memref<1x1632xf32, #tpu.memory_space<vmem>>, vector<1x1632xf32>,
    return
  }
}

</mosaic_0001>

<bundles_post_ra>
// kernel: conv2d_1x1.1
= control target key start
LH: loop header
LB: loop body
LE: loop exit
PB: predicated region body
PF: predicated region fallthrough
CT: control target
= control target key end

     0   :  { %8 = vsyncpa [#allocation3], 0  ;;  %s1082_s0 = inlined_call_operand.vmem [shape: f32[1,68], index: 0, kind: input, shape index: {}]   ;;  %s1083_s1 = inlined_call_operand.hbm [shape: f32[68,1632], index: 1, kind: input, shape index: {}]   ;;  %s1084_s2 = inlined_call_operand.vmem [shape: f32[1,1632], index: 2, kind: input, shape index: {}]   ;;  %s1085_s3 = inlined_call_operand.hbm [shape: f32[1,1632], index: 3, kind: output, shape index: {}]  }
   0x1   :  { %9 = vsyncpa [#allocation4], 0  ;;  %s982_s12 = smov [#allocation2]  }
   0x2   :  { %s17_s13 = sshll.u32 %s982_s12, 4  ;;  %s18_s13 = int_to_ptr.vmem [resolvable:$true] %s17_s13 }
   0x3   :  { %s946_s14 = scalar_lea.vmem %s18_s13, 14976  ;;  %p951_p1 = scmp.lt.s32.totalorder %s18_s13, %s18_s13 }
   0x4   :  { %p947_p0 = scmp.ne.s32.totalorder %s18_s13, %s946_s14  ;;  %p952_p2 = scmp.lt.s32.totalorder %s946_s14, %s946_s14 }
   0x6   :  { %p953_p3 = por %p952_p2, %p951_p1 }
   0x8   :  { %p954_p4 = pnand %p953_p3, %p947_p0 }
   0xa   :  { %957 = shalt.err (!%p954_p4)
}
   0xb   :  { %s983_s15 = smov 1664   ;;  %s984_s16 = smov 104  }
   0xc   :  { %23 = dma.hbm_to_vmem [thread:$0]  %s1083_s1, 14976, %s18_s13, [#allocation3], %s983_s15, %s983_s15, %s984_s16  }
   0xd   :  { %978 = dma.done.wait [#allocation3], 14976  }
   0xe   :  { %979 = vsyncadd [#allocation3], 4294952320  ;;  %v985_v0 = vmov 0.0   ;;  %vm220_vm0 = vcmask 1043456   ;;  %v135_v1 = vld [vmem:[#allocation2 + $0x348] sm:$0xf] }
   0xf   :  { %324 = vmatprep.mubr.f32.mxu0 %v985_v0  ;;  %395 = vmatprep.mubr.f32.mxu1 %v985_v0  ;;  %v137_v2 = vld [vmem:[#allocation2 + $0x358] sm:$0xf]  ;;  %v134_v3 = vld [vmem:[#allocation2 + $0x340] sm:$0xf]  ;;  %v136_v4 = vld [vmem:[#allocation2 + $0x350] sm:$0xf] }
  0x10   :  { %880 = vmatprep.subr.msk.mxu0 %vm220_vm0, %v135_v1  ;;  %883 = vmatprep.subr.msk.mxu1 %vm220_vm0, %v137_v2  ;;  %v122_v5 = vld [vmem:[#allocation2 + $0x2e0] sm:$0xff]  ;;  %v124_v6 = vld [vmem:[#allocation2 + $0x2f0] sm:$0xff]  ;;  %v121_v7 = vld [vmem:[#allocation2 + $0x2d8] sm:$0xff]  ;;  %vm216_vm1 = vcmask 556032   ;;  %vm986_vm2 = vmmov 0  }
  0x11   :  { %881 = vmatpush1.msk.msra.mxu0 %vm220_vm0, %v134_v3  ;;  %884 = vmatpush1.msk.msra.mxu1 %vm220_vm0, %v136_v4  ;;  %v123_v8 = vld [vmem:[#allocation2 + $0x2e8] sm:$0xff]  ;;  %v109_v9 = vld [vmem:[#allocation2 + $0x278] sm:$0xff]  ;;  %v108_v11 = vld [vmem:[#allocation2 + $0x270] sm:$0xff] }
  0x12   :  { %276 = vmatprep.subr.mxu0 %v122_v5  ;;  %347 = vmatprep.subr.mxu1 %v124_v6  ;;  %v111_v10 = vld [vmem:[#allocation2 + $0x288] sm:$0xff]  ;;  %v110_v12 = vld [vmem:[#allocation2 + $0x280] sm:$0xff]  ;;  %v96_v13 = vld [vmem:[#allocation2 + $0x210] sm:$0xff] }
  0x13   :  { %277 = vmatpush1.msra.mxu0 %v121_v7  ;;  %348 = vmatpush1.msra.mxu1 %v123_v8  ;;  %v98_v14 = vld [vmem:[#allocation2 + $0x220] sm:$0xff]  ;;  %v95_v15 = vld [vmem:[#allocation2 + $0x208] sm:$0xff]  ;;  %v97_v16 = vld [vmem:[#allocation2 + $0x218] sm:$0xff] }
  0x14   :  { %278 = vmatprep.subr.mxu0 %v109_v9  ;;  %349 = vmatprep.subr.mxu1 %v111_v10  ;;  %v83_v17 = vld [vmem:[#allocation2 + $0x1a8] sm:$0xff]  ;;  %v85_v18 = vld [vmem:[#allocation2 + $0x1b8] sm:$0xff]  ;;  %v82_v19 = vld [vmem:[#allocation2 + $0x1a0] sm:$0xff] }
  0x15   :  { %279 = vmatpush1.msra.mxu0 %v108_v11  ;;  %350 = vmatpush1.msra.mxu1 %v110_v12  ;;  %v84_v20 = vld [vmem:[#allocation2 + $0x1b0] sm:$0xff]  ;;  %v70_v21 = vld [vmem:[#allocation2 + $0x140] sm:$0xff]  ;;  %v69_v23 = vld [vmem:[#allocation2 + $0x138] sm:$0xff] }
  0x16   :  { %280 = vmatprep.subr.mxu0 %v96_v13  ;;  %351 = vmatprep.subr.mxu1 %v98_v14  ;;  %v72_v22 = vld [vmem:[#allocation2 + $0x150] sm:$0xff]  ;;  %v71_v24 = vld [vmem:[#allocation2 + $0x148] sm:$0xff]  ;;  %v57_v25 = vld [vmem:[#allocation2 + $0xd8] sm:$0xff] }
  0x17   :  { %281 = vmatpush1.msra.mxu0 %v95_v15  ;;  %352 = vmatpush1.msra.mxu1 %v97_v16  ;;  %v59_v26 = vld [vmem:[#allocation2 + $0xe8] sm:$0xff]  ;;  %v56_v27 = vld [vmem:[#allocation2 + $0xd0] sm:$0xff]  ;;  %v58_v28 = vld [vmem:[#allocation2 + $0xe0] sm:$0xff] }
  0x18   :  { %282 = vmatprep.subr.mxu0 %v83_v17  ;;  %353 = vmatprep.subr.mxu1 %v85_v18  ;;  %v44_v29 = vld [vmem:[#allocation2 + $0x70] sm:$0xff]  ;;  %v46_v30 = vld [vmem:[#allocation2 + $0x80] sm:$0xff]  ;;  %v43_v31 = vld [vmem:[#allocation2 + $0x68] sm:$0xff] }
  0x19   :  { %283 = vmatpush1.msra.mxu0 %v82_v19  ;;  %354 = vmatpush1.msra.mxu1 %v84_v20  ;;  %v45_v32 = vld [vmem:[#allocation2 + $0x78] sm:$0xff]  ;;  %v31_v33 = vld [vmem:[#allocation2 + $0x8] sm:$0xff]  ;;  %v30_v35 = vld [vmem:[#allocation2] sm:$0xff] }
  0x1a   :  { %284 = vmatprep.subr.mxu0 %v70_v21  ;;  %355 = vmatprep.subr.mxu1 %v72_v22  ;;  %v33_v34 = vld [vmem:[#allocation2 + $0x18] sm:$0xff]  ;;  %v32_v36 = vld [vmem:[#allocation2 + $0x10] sm:$0xff]  ;;  %v1021_v37 = vld [vmem:[%s1082_s0] sm:$0x1] }
  0x1b   :  { %285 = vmatpush1.msra.mxu0 %v69_v23  ;;  %356 = vmatpush1.msra.mxu1 %v71_v24  ;;  %v139_v38 = vld [vmem:[#allocation2 + $0x368] sm:$0xf]  ;;  %v141_v39 = vld [vmem:[#allocation2 + $0x378] sm:$0xf]  ;;  %v138_v40 = vld [vmem:[#allocation2 + $0x360] sm:$0xf] }
  0x1c   :  { %286 = vmatprep.subr.mxu0 %v57_v25  ;;  %357 = vmatprep.subr.mxu1 %v59_v26  ;;  %v140_v41 = vld [vmem:[#allocation2 + $0x370] sm:$0xf]  ;;  %v126_v42 = vld [vmem:[#allocation2 + $0x300] sm:$0xff]  ;;  %v125_v44 = vld [vmem:[#allocation2 + $0x2f8] sm:$0xff] }
  0x1d   :  { %287 = vmatpush1.msra.mxu0 %v56_v27  ;;  %358 = vmatpush1.msra.mxu1 %v58_v28  ;;  %v128_v43 = vld [vmem:[#allocation2 + $0x310] sm:$0xff]  ;;  %v127_v45 = vld [vmem:[#allocation2 + $0x308] sm:$0xff]  ;;  %v113_v46 = vld [vmem:[#allocation2 + $0x298] sm:$0xff] }
  0x1e   :  { %288 = vmatprep.subr.mxu0 %v44_v29  ;;  %359 = vmatprep.subr.mxu1 %v46_v30  ;;  %v115_v47 = vld [vmem:[#allocation2 + $0x2a8] sm:$0xff]  ;;  %v112_v48 = vld [vmem:[#allocation2 + $0x290] sm:$0xff]  ;;  %v114_v49 = vld [vmem:[#allocation2 + $0x2a0] sm:$0xff] }
  0x1f   :  { %289 = vmatpush1.msra.mxu0 %v43_v31  ;;  %360 = vmatpush1.msra.mxu1 %v45_v32  ;;  %v100_v50 = vld [vmem:[#allocation2 + $0x230] sm:$0xff]  ;;  %v102_v51 = vld [vmem:[#allocation2 + $0x240] sm:$0xff]  ;;  %v99_v52 = vld [vmem:[#allocation2 + $0x228] sm:$0xff] }
  0x20   :  { %290 = vmatprep.subr.mxu0 %v31_v33  ;;  %361 = vmatprep.subr.mxu1 %v33_v34  ;;  %v101_v53 = vld [vmem:[#allocation2 + $0x238] sm:$0xff]  ;;  %v87_v54 = vld [vmem:[#allocation2 + $0x1c8] sm:$0xff]  ;;  %v86_v56 = vld [vmem:[#allocation2 + $0x1c0] sm:$0xff] }
  0x21   :  { %291 = vmatpush1.msra.mxu0 %v30_v35  ;;  %362 = vmatpush1.msra.mxu1 %v32_v36  ;;  %v89_v55 = vld [vmem:[#allocation2 + $0x1d8] sm:$0xff]  ;;  %v88_v57 = vld [vmem:[#allocation2 + $0x1d0] sm:$0xff]  ;;  %v74_v58 = vld [vmem:[#allocation2 + $0x160] sm:$0xff] }
  0x22   :  { %882 = vmatmul.mubr.msk.f32.vlgmr.msra.gmra.mxu0 %vm216_vm1, %v1021_v37  ;;  %885 = vmatmul.mubr.msk.f32.vlgmr.msra.gmra.mxu1 %vm216_vm1, %v1021_v37  ;;  %v76_v59 = vld [vmem:[#allocation2 + $0x170] sm:$0xff]  ;;  %v73_v60 = vld [vmem:[#allocation2 + $0x158] sm:$0xff]  ;;  %v75_v61 = vld [vmem:[#allocation2 + $0x168] sm:$0xff] }
  0x23   :  { %886 = vmatprep.subr.msk.mxu0 %vm220_vm0, %v139_v38  ;;  %889 = vmatprep.subr.msk.mxu1 %vm220_vm0, %v141_v39  ;;  %v61_v62 = vld [vmem:[#allocation2 + $0xf8] sm:$0xff]  ;;  %v63_v63 = vld [vmem:[#allocation2 + $0x108] sm:$0xff]  ;;  %v60_v1 = vld [vmem:[#allocation2 + $0xf0] sm:$0xff] }
  0x24   :  { %887 = vmatpush1.msk.msra.mxu0 %vm220_vm0, %v138_v40  ;;  %890 = vmatpush1.msk.msra.mxu1 %vm220_vm0, %v140_v41  ;;  %v62_v2 = vld [vmem:[#allocation2 + $0x100] sm:$0xff]  ;;  %v48_v3 = vld [vmem:[#allocation2 + $0x90] sm:$0xff]  ;;  %v47_v5 = vld [vmem:[#allocation2 + $0x88] sm:$0xff] }
  0x25   :  { %418 = vmatprep.subr.mxu0 %v126_v42  ;;  %489 = vmatprep.subr.mxu1 %v128_v43  ;;  %v50_v4 = vld [vmem:[#allocation2 + $0xa0] sm:$0xff]  ;;  %v49_v6 = vld [vmem:[#allocation2 + $0x98] sm:$0xff]  ;;  %v35_v7 = vld [vmem:[#allocation2 + $0x28] sm:$0xff] }
  0x26   :  { %419 = vmatpush1.msra.mxu0 %v125_v44  ;;  %490 = vmatpush1.msra.mxu1 %v127_v45  ;;  %v37_v8 = vld [vmem:[#allocation2 + $0x38] sm:$0xff]  ;;  %v34_v9 = vld [vmem:[#allocation2 + $0x20] sm:$0xff]  ;;  %v36_v10 = vld [vmem:[#allocation2 + $0x30] sm:$0xff] }
  0x27   :  { %420 = vmatprep.subr.mxu0 %v113_v46  ;;  %491 = vmatprep.subr.mxu1 %v115_v47  ;;  %v143_v11 = vld [vmem:[#allocation2 + $0x388] sm:$0xf]  ;;  %v145_v12 = vld [vmem:[#allocation2 + $0x398] sm:$0xf]  ;;  %v142_v13 = vld [vmem:[#allocation2 + $0x380] sm:$0xf] }
  0x28   :  { %421 = vmatpush1.msra.mxu0 %v112_v48  ;;  %492 = vmatpush1.msra.mxu1 %v114_v49  ;;  %v144_v14 = vld [vmem:[#allocation2 + $0x390] sm:$0xf]  ;;  %v130_v15 = vld [vmem:[#allocation2 + $0x320] sm:$0xff]  ;;  %v129_v17 = vld [vmem:[#allocation2 + $0x318] sm:$0xff] }
  0x29   :  { %422 = vmatprep.subr.mxu0 %v100_v50  ;;  %493 = vmatprep.subr.mxu1 %v102_v51  ;;  %v132_v16 = vld [vmem:[#allocation2 + $0x330] sm:$0xff]  ;;  %v131_v18 = vld [vmem:[#allocation2 + $0x328] sm:$0xff]  ;;  %v117_v19 = vld [vmem:[#allocation2 + $0x2b8] sm:$0xff] }
  0x2a   :  { %423 = vmatpush1.msra.mxu0 %v99_v52  ;;  %494 = vmatpush1.msra.mxu1 %v101_v53  ;;  %v119_v20 = vld [vmem:[#allocation2 + $0x2c8] sm:$0xff]  ;;  %v116_v21 = vld [vmem:[#allocation2 + $0x2b0] sm:$0xff]  ;;  %v118_v22 = vld [vmem:[#allocation2 + $0x2c0] sm:$0xff] }
  0x2b   :  { %424 = vmatprep.subr.mxu0 %v87_v54  ;;  %495 = vmatprep.subr.mxu1 %v89_v55  ;;  %v104_v23 = vld [vmem:[#allocation2 + $0x250] sm:$0xff]  ;;  %v106_v24 = vld [vmem:[#allocation2 + $0x260] sm:$0xff]  ;;  %v103_v25 = vld [vmem:[#allocation2 + $0x248] sm:$0xff] }
  0x2c   :  { %425 = vmatpush1.msra.mxu0 %v86_v56  ;;  %496 = vmatpush1.msra.mxu1 %v88_v57  ;;  %v105_v26 = vld [vmem:[#allocation2 + $0x258] sm:$0xff]  ;;  %v91_v27 = vld [vmem:[#allocation2 + $0x1e8] sm:$0xff]  ;;  %v90_v29 = vld [vmem:[#allocation2 + $0x1e0] sm:$0xff]  ;;  %v151_v57 = vlaneseq }
  0x2d   :  { %426 = vmatprep.subr.mxu0 %v74_v58  ;;  %497 = vmatprep.subr.mxu1 %v76_v59  ;;  %v93_v28 = vld [vmem:[#allocation2 + $0x1f8] sm:$0xff]  ;;  %v92_v30 = vld [vmem:[#allocation2 + $0x1f0] sm:$0xff]  ;;  %v78_v31 = vld [vmem:[#allocation2 + $0x180] sm:$0xff] }
  0x2e   :  { %427 = vmatpush1.msra.mxu0 %v73_v60  ;;  %498 = vmatpush1.msra.mxu1 %v75_v61  ;;  %v80_v32 = vld [vmem:[#allocation2 + $0x190] sm:$0xff]  ;;  %v77_v33 = vld [vmem:[#allocation2 + $0x178] sm:$0xff]  ;;  %v79_v34 = vld [vmem:[#allocation2 + $0x188] sm:$0xff]  ;;  %v1061_v58 = vshrl.u32 %v151_v57, 7  ;;  %vm862_vm3 = vcmp.lt.s32.totalorder %v151_v57, 608 }
  0x2f   :  { %428 = vmatprep.subr.mxu0 %v61_v62  ;;  %499 = vmatprep.subr.mxu1 %v63_v63  ;;  %v65_v35 = vld [vmem:[#allocation2 + $0x118] sm:$0xff]  ;;  %v67_v36 = vld [vmem:[#allocation2 + $0x128] sm:$0xff]  ;;  %v64_v38 = vld [vmem:[#allocation2 + $0x110] sm:$0xff] }
  0x30   :  { %429 = vmatpush1.msra.mxu0 %v60_v1  ;;  %500 = vmatpush1.msra.mxu1 %v62_v2  ;;  %v66_v39 = vld [vmem:[#allocation2 + $0x120] sm:$0xff]  ;;  %v52_v40 = vld [vmem:[#allocation2 + $0xb0] sm:$0xff]  ;;  %v51_v42 = vld [vmem:[#allocation2 + $0xa8] sm:$0xff]  ;;  %v153_v59 = vsub.s32 0, %v1061_v58  ;;  %v161_v60 = vsub.s32 2, %v1061_v58  ;;  %v157_v61 = vsub.s32 1, %v1061_v58 }
  0x31   :  { %430 = vmatprep.subr.mxu0 %v48_v3  ;;  %501 = vmatprep.subr.mxu1 %v50_v4  ;;  %v54_v41 = vld [vmem:[#allocation2 + $0xc0] sm:$0xff]  ;;  %v53_v43 = vld [vmem:[#allocation2 + $0xb8] sm:$0xff]  ;;  %v39_v44 = vld [vmem:[#allocation2 + $0x48] sm:$0xff]  ;;  %v165_v62 = vsub.s32 3, %v1061_v58  ;;  %v987_v2 = vmov 1966171168  }
  0x32   :  { %431 = vmatpush1.msra.mxu0 %v47_v5  ;;  %502 = vmatpush1.msra.mxu1 %v49_v6  ;;  %v41_v45 = vld [vmem:[#allocation2 + $0x58] sm:$0xff]  ;;  %v38_v46 = vld [vmem:[#allocation2 + $0x40] sm:$0xff]  ;;  %v40_v47 = vld [vmem:[#allocation2 + $0x50] sm:$0xff] }
  0x33   :  { %432 = vmatprep.subr.mxu0 %v35_v7  ;;  %503 = vmatprep.subr.mxu1 %v37_v8  ;;  %v146_v48 = vld [vmem:[#allocation2 + $0x3a0] sm:$0xf]  ;;  %v133_v49 = vld [vmem:[#allocation2 + $0x338] sm:$0xff]  ;;  %v120_v50 = vld [vmem:[#allocation2 + $0x2d0] sm:$0xff] }
  0x34   :  { %433 = vmatpush1.msra.mxu0 %v34_v9  ;;  %466 = vmatprep.mubr.f32.mxu0 %v985_v0  ;;  %v107_v51 = vld [vmem:[#allocation2 + $0x268] sm:$0xff]  ;;  %v94_v52 = vld [vmem:[#allocation2 + $0x200] sm:$0xff]  ;;  %v81_v53 = vld [vmem:[#allocation2 + $0x198] sm:$0xff]  ;;  %v169_v9 = vsub.s32 4, %v1061_v58 }
  0x35   :  { %504 = vmatpush1.msra.mxu1 %v36_v10  ;;  %537 = vmatprep.mubr.f32.mxu1 %v985_v0  ;;  %v68_v54 = vld [vmem:[#allocation2 + $0x130] sm:$0xff]  ;;  %v55_v55 = vld [vmem:[#allocation2 + $0xc8] sm:$0xff]  ;;  %v42_v56 = vld [vmem:[#allocation2 + $0x60] sm:$0xff]  ;;  %v177_v10 = vsub.s32 6, %v1061_v58 }
  0x36   :  { %888 = vmatmul.mubr.msk.f32.vlgmr.msra.gmra.mxu0 %vm216_vm1, %v1021_v37  ;;  %891 = vmatmul.mubr.msk.f32.vlgmr.msra.gmra.mxu1 %vm216_vm1, %v1021_v37 }
  0x37   :  { %892 = vmatprep.subr.msk.mxu0 %vm220_vm0, %v143_v11  ;;  %895 = vmatprep.subr.msk.mxu1 %vm220_vm0, %v145_v12  ;;  %v173_v12 = vsub.s32 5, %v1061_v58 }
  0x38   :  { %893 = vmatpush1.msk.msra.mxu0 %vm220_vm0, %v142_v13  ;;  %896 = vmatpush1.msk.msra.mxu1 %vm220_vm0, %v144_v14  ;;  %v181_v13 = vsub.s32 7, %v1061_v58 }
  0x39   :  { %560 = vmatprep.subr.mxu0 %v130_v15  ;;  %631 = vmatprep.subr.mxu1 %v132_v16 }
  0x3a   :  { %561 = vmatpush1.msra.mxu0 %v129_v17  ;;  %632 = vmatpush1.msra.mxu1 %v131_v18 }
  0x3b   :  { %562 = vmatprep.subr.mxu0 %v117_v19  ;;  %633 = vmatprep.subr.mxu1 %v119_v20 }
  0x3c   :  { %563 = vmatpush1.msra.mxu0 %v116_v21  ;;  %634 = vmatpush1.msra.mxu1 %v118_v22 }
  0x3d   :  { %564 = vmatprep.subr.mxu0 %v104_v23  ;;  %635 = vmatprep.subr.mxu1 %v106_v24 }
  0x3e   :  { %565 = vmatpush1.msra.mxu0 %v103_v25  ;;  %636 = vmatpush1.msra.mxu1 %v105_v26 }
  0x3f   :  { %566 = vmatprep.subr.mxu0 %v91_v27  ;;  %637 = vmatprep.subr.mxu1 %v93_v28 }
  0x40   :  { %567 = vmatpush1.msra.mxu0 %v90_v29  ;;  %638 = vmatpush1.msra.mxu1 %v92_v30 }
  0x41   :  { %568 = vmatprep.subr.mxu0 %v78_v31  ;;  %639 = vmatprep.subr.mxu1 %v80_v32 }
  0x42   :  { %569 = vmatpush1.msra.mxu0 %v77_v33  ;;  %640 = vmatpush1.msra.mxu1 %v79_v34 }
  0x43   :  { %570 = vmatprep.subr.mxu0 %v65_v35  ;;  %641 = vmatprep.subr.mxu1 %v67_v36 }
  0x44   :  { %571 = vmatpush1.msra.mxu0 %v64_v38  ;;  %642 = vmatpush1.msra.mxu1 %v66_v39 }
  0x45   :  { %572 = vmatprep.subr.mxu0 %v52_v40  ;;  %643 = vmatprep.subr.mxu1 %v54_v41 }
  0x46   :  { %573 = vmatpush1.msra.mxu0 %v51_v42  ;;  %644 = vmatpush1.msra.mxu1 %v53_v43 }
  0x47   :  { %574 = vmatprep.subr.mxu0 %v39_v44  ;;  %645 = vmatprep.subr.mxu1 %v41_v45  ;;  %v148_v45 = vld [vmem:[%s1084_s2 + $0x8] sm:$0x1f] }
  0x48   :  { %575 = vmatpush1.msra.mxu0 %v38_v46  ;;  %608 = vmatprep.mubr.f32.mxu0 %v985_v0 }
  0x49   :  { %646 = vmatpush1.msra.mxu1 %v40_v47  ;;  %679 = vmatprep.mubr.f32.mxu1 %v985_v0 }
  0x4a   :  { %894 = vmatmul.mubr.msk.f32.vlgmr.msra.gmra.mxu0 %vm216_vm1, %v1021_v37  ;;  %897 = vmatmul.mubr.msk.f32.vlgmr.msra.gmra.mxu1 %vm216_vm1, %v1021_v37 }
  0x4b   :  { %910 = vmatprep.subr.mxu0 %v985_v0  ;;  %928 = vmatprep.mubr.msk.f32.mxu0 %vm986_vm2, %v985_v0 }
  0x4c   :  { %911 = vmatpush3.msk.msra.mxu0 %vm220_vm0, %v146_v48  ;;  %v186_v48 = vrot.slane %v148_v45, %v153_v59 }
  0x4d   :  { %912 = vmatprep.subr.mxu0 %v985_v0 }
  0x4e   :  { %913 = vmatpush3.msra.mxu0 %v133_v49  ;;  %v194_v49 = vrot.slane %v148_v45, %v161_v60 }
  0x4f   :  { %914 = vmatprep.subr.mxu0 %v985_v0 }
  0x50   :  { %915 = vmatpush3.msra.mxu0 %v120_v50  ;;  %v190_v50 = vrot.slane %v148_v45, %v157_v61 }
  0x51   :  { %916 = vmatprep.subr.mxu0 %v985_v0 }
  0x52   :  { %917 = vmatpush3.msra.mxu0 %v107_v51  ;;  %v198_v51 = vrot.slane %v148_v45, %v165_v62 }
  0x53   :  { %918 = vmatprep.subr.mxu0 %v985_v0 }
  0x54   :  { %919 = vmatpush3.msra.mxu0 %v94_v52 }
  0x55   :  { %920 = vmatprep.subr.mxu0 %v985_v0 }
  0x56   :  { %921 = vmatpush3.msra.mxu0 %v81_v53 }
  0x57   :  { %922 = vmatprep.subr.mxu0 %v985_v0 }
  0x58   :  { %923 = vmatpush3.msra.mxu0 %v68_v54 }
  0x59   :  { %924 = vmatprep.subr.mxu0 %v985_v0 }
  0x5a   :  { %925 = vmatpush3.msra.mxu0 %v55_v55 }
  0x5b   :  { %926 = vmatprep.subr.mxu0 %v985_v0  ;;  %v147_v0 = vld [vmem:[%s1084_s2] sm:$0xff]  ;;  %s988_s2 = smov [#allocation5]  }
  0x5c   :  { %927 = vmatpush3.msra.mxu0 %v42_v56  ;;  %v154_v3 = vrot.slane %v147_v0, %v153_v59  ;;  %v162_v4 = vrot.slane %v147_v0, %v161_v60  ;;  %v158_v5 = vrot.slane %v147_v0, %v157_v61  ;;  %v166_v6 = vrot.slane %v147_v0, %v165_v62  ;;  %s871_s23 = sshll.u32 %s988_s2, 4  ;;  %s872_s23 = int_to_ptr.vmem [resolvable:$true] %s871_s23 }
  0x5d   :  { %929 = vmatmul.mubr.msk.f32.vlgmr.msra.gmra.mxu0 %vm216_vm1, %v1021_v37  ;;  %v774_v37 = vunpack.c.l.s4 %v987_v2  ;;  %v170_v18 = vrot.slane %v147_v0, %v169_v9  ;;  %v178_v19 = vrot.slane %v147_v0, %v177_v10  ;;  %v174_v23 = vrot.slane %v147_v0, %v173_v12  ;;  %s958_s24 = scalar_lea.vmem %s872_s23, 208  ;;  %s962_s25 = scalar_lea.vmem %s872_s23, 224 }
  0x5e   :  { %v182_v24 = vrot.slane %v147_v0, %v181_v13  ;;  %p959_p5 = scmp.ne.s32.totalorder %s872_s23, %s958_s24  ;;  %p963_p6 = scmp.lt.s32.totalorder %s872_s23, %s872_s23 }
  0x5f   :  { %v775_v11 = vunpack.c.0.s8 %v774_v37  ;;  %v202_v37 = vrot.slane %v148_v45, %v169_v9  ;;  %p964_p7 = scmp.lt.s32.totalorder %s962_s25, %s958_s24 }
  0x61   :  { %v778_v20 = vsub.s32 %v775_v11, %v1061_v58  ;;  %p965_p8 = por %p964_p7, %p963_p6 }
  0x63   :  { %p966_p9 = pnand %p965_p8, %p959_p5 }
  0xe2   :  { %v326_v63 = vpop.f32.mrf.mxu0  ;;  %v397_v1 = vpop.f32.mrf.mxu1 }
  0xe3   :  { %v327_v14 = vadd.f32 %v326_v63, %v154_v3  ;;  %v398_v15 = vadd.f32 %v397_v1, %v162_v4 }
  0xe4   :  { %v328_v7 = vpop.f32.mrf.mxu0  ;;  %v399_v8 = vpop.f32.mrf.mxu1 }
  0xe5   :  { %v329_v16 = vadd.f32 %v328_v7, %v158_v5  ;;  %v400_v17 = vadd.f32 %v399_v8, %v166_v6 }
  0xe7   :  { %v769_v21 = vcombine.low %v327_v14, %v329_v16  ;;  %v770_v22 = vcombine.low %v398_v15, %v400_v17 }
  0xe9   :  { %v779_v31 = vrot.slane %v769_v21, %v778_v20  ;;  %v786_v32 = vrot.slane %v770_v22, %v778_v20 }
  0xeb   :  { %v801_v38 = vcombine.low %v779_v31, %v786_v32 }
  0xed   :  { %v809_v42 = vrot.slane %v801_v38, %v778_v20 }
  0xf6   :  { %v468_v25 = vpop.f32.mrf.mxu0  ;;  %v539_v26 = vpop.f32.mrf.mxu1 }
  0xf7   :  { %v469_v27 = vadd.f32 %v468_v25, %v170_v18  ;;  %v540_v28 = vadd.f32 %v539_v26, %v178_v19 }
  0xf8   :  { %v470_v29 = vpop.f32.mrf.mxu0  ;;  %v541_v30 = vpop.f32.mrf.mxu1 }
  0xf9   :  { %v471_v33 = vadd.f32 %v470_v29, %v174_v23  ;;  %v542_v34 = vadd.f32 %v541_v30, %v182_v24 }
  0xfb   :  { %v771_v35 = vcombine.low %v469_v27, %v471_v33  ;;  %v772_v36 = vcombine.low %v540_v28, %v542_v34 }
  0xfd   :  { %v793_v39 = vrot.slane %v771_v35, %v778_v20  ;;  %v800_v40 = vrot.slane %v772_v36, %v778_v20 }
  0xff   :  { %v802_v41 = vcombine.low %v793_v39, %v800_v40 }
 0x101   :  { %v816_v43 = vrot.slane %v802_v41, %v778_v20 }
 0x103   :  { %v817_v44 = vcombine.low %v809_v42, %v816_v43 }
 0x105   :  { %859 = vst [vmem:[#allocation5] sm:$0xff] %v817_v44 }
 0x10a   :  { %v610_v46 = vpop.f32.mrf.mxu0  ;;  %v681_v47 = vpop.f32.mrf.mxu1 }
 0x10b   :  { %v611_v54 = vadd.f32 %v610_v46, %v186_v48  ;;  %v682_v55 = vadd.f32 %v681_v47, %v194_v49 }
 0x10c   :  { %v612_v52 = vpop.f32.mrf.mxu0  ;;  %v683_v53 = vpop.f32.mrf.mxu1 }
 0x10d   :  { %v613_v56 = vadd.f32 %v612_v52, %v190_v50  ;;  %v684_v58 = vadd.f32 %v683_v53, %v198_v51 }
 0x10f   :  { %v818_v0 = vcombine.low %v611_v54, %v613_v56  ;;  %v819_v63 = vcombine.low %v682_v55, %v684_v58 }
 0x111   :  { %v826_v1 = vrot.slane %v818_v0, %v778_v20  ;;  %v833_v2 = vrot.slane %v819_v63, %v778_v20 }
 0x113   :  { %v841_v4 = vcombine.low %v826_v1, %v833_v2 }
 0x115   :  { %v848_v59 = vrot.slane %v841_v4, %v778_v20 }
 0x11d   :  { %v752_v3 = vpop.f32.mrf.mxu0 }
 0x11e   :  { %v753_v5 = vadd.f32 %v752_v3, %v202_v37 }
 0x11f   :  { %v930_v6 = vpop.f32.mrf.mxu0 }
 0x120   :  { %v840_v7 = vrot.slane %v753_v5, %v778_v20 }
 0x122   :  { %v855_v60 = vrot.slane %v840_v7, %v778_v20 }
 0x124   :  { %v856_v61 = vcombine.low %v848_v59, %v855_v60 }
 0x126   :  { %864 = vst.msk [vmem:[#allocation5 + $0x8] sm:$0x1f] %vm862_vm3, %v856_v61 }
 0x127   :  { %969 = shalt.err (!%p966_p9)
}
 0x128   :  { %874 = dma.vmem_to_hbm [thread:$0]  %s872_s23, 208, %s1085_s3, [#allocation4]  }
 0x129   :  { %980 = dma.done.wait [#allocation4], 208  }
 0x12a   :  { %981 = vsyncadd [#allocation4], 4294967088 }
 0x12b   :  { %878 = vsyncpa [#allocation3], 1 }
 0x12c   :  { %879 = vsyncpa [#allocation4], 1 }

</bundles_post_ra>
